<compile_context>
chip_gen: v5e
topology: v5e:2x2
jax: 0.10.0
libtpu: 0.0.40
codegen_flags: <defaults>
</compile_context>

<pallas_src>
import functools

import jax
import jax.numpy as jnp
import numpy as np
from jax import lax
from jax.experimental import pallas as pl
from jax.experimental.pallas import tpu as pltpu


def _round_up8(c):
    return ((c + 7) // 8) * 8


def _make_kernel(chunk_info, c_pad, h, w, n):
    """chunk_info: tuple of (slot_offset, num_channels, slot_size) per chunk."""
    hw = h * w
    total = n * hw
    taps = [(dy, dx) for dy in (-1, 0, 1) for dx in (-1, 0, 1)]
    n_chunks = len(chunk_info)

    def kernel(*refs):
        x_refs = refs[:n_chunks]
        w_ref, scale_ref, shift_ref, mask_ref = refs[n_chunks:n_chunks + 4]
        o_ref = refs[n_chunks + 4]
        xn_ref, patches_ref = refs[n_chunks + 5:]

        # 1) Zero only the slot-pad channel rows: they are never overwritten
        #    below but feed the conv taps, and uninitialized VMEM could be NaN
        #    (0 * NaN = NaN would leak into the matmul).
        for (slot, c_k, ssz) in chunk_info:
            if ssz > c_k:
                xn_ref[slot + c_k:slot + ssz, :] = jnp.zeros(
                    (ssz - c_k, total), jnp.float32)

        # 2) Fused channel-concat + BN (inference) + ReLU for ALL images:
        #    image b lands in the 128-aligned lane block [b*HW, (b+1)*HW).
        #    BN/ReLU math stays f32 (cast to bf16 only at the MXU boundary).
        for (slot, c_k, _), x_ref in zip(chunk_info, x_refs):
            sc = scale_ref[slot:slot + c_k, :]               # (c_k, 1)
            sh = shift_ref[slot:slot + c_k, :]
            for b in range(n):
                xn_ref[slot:slot + c_k, b * hw:(b + 1) * hw] = jnp.maximum(
                    x_ref[b] * sc + sh, 0.0)

        xn = xn_ref[...]                                     # (c_pad, N*HW) f32
        mask = mask_ref[...]                                 # (9, N*HW) f32

        # 3) im2col via XLU lane rolls + per-tap validity mask.  For every
        #    valid output position the rolled source stays inside the same
        #    image's lane block; every wrapped / cross-image lane corresponds
        #    to an invalid tap and is zeroed by the mask (== conv zero pad,
        #    applied AFTER BN+ReLU, exactly as in PyTorch).  Cast to bf16 at
        #    the store to halve patch traffic.
        for t, (dy, dx) in enumerate(taps):
            off = dy * w + dx
            if off == 0:
                tapped = xn                                  # center tap: mask all ones
            else:
                tapped = pltpu.roll(xn, shift=(-off) % total, axis=1) * mask[t:t + 1, :]
            patches_ref[t * c_pad:(t + 1) * c_pad, :] = tapped.astype(jnp.bfloat16)

        # 4) Single K = 9*C_pad matmul on the MXU: bf16 operands, f32
        #    accumulation, lane-dense (Cout, N*HW) result.
        out = jnp.dot(w_ref[...], patches_ref[...],
                      preferred_element_type=jnp.float32)

        # 5) Per-image lane-dense (128-aligned, HW-wide) output stores.
        for b in range(n):
            o_ref[b] = out[:, b * hw:(b + 1) * hw].astype(o_ref.dtype)

    return kernel


def prepare_dense_layer_params(gamma, beta, running_mean, running_var, conv_w,
                               chunk_channels, eps=1e-5):
    """One-time (per layer) parameter prep, hoisted out of the forward path.

    Folds eval-mode BatchNorm into per-channel scale/shift, scatters params and
    conv input channels into 8-aligned channel slots (pad channels get zero
    scale/shift and zero weight columns), and lays the weights out tap-major /
    channel-minor as (Cout, 9*C_pad) bf16 to match the kernel's patch matrix.
    """
    gamma = np.asarray(gamma, np.float32)
    beta = np.asarray(beta, np.float32)
    mean = np.asarray(running_mean, np.float32)
    var = np.asarray(running_var, np.float32)
    wgt = np.asarray(conv_w, np.float32)

    scale = gamma / np.sqrt(var + eps)
    shift = beta - mean * scale

    slots = [_round_up8(int(c)) for c in chunk_channels]
    slot_off = [int(x) for x in np.cumsum([0] + slots[:-1])]
    c_pad = int(sum(slots))
    cout = int(wgt.shape[0])

    scale_p = np.zeros((c_pad, 1), np.float32)
    shift_p = np.zeros((c_pad, 1), np.float32)
    w_pad = np.zeros((cout, c_pad, 3, 3), np.float32)
    base = 0
    for c, off in zip(chunk_channels, slot_off):
        scale_p[off:off + c, 0] = scale[base:base + c]
        shift_p[off:off + c, 0] = shift[base:base + c]
        w_pad[:, off:off + c] = wgt[:, base:base + c]
        base += c

    # (Cout, C_pad, 3, 3) -> (Cout, 3, 3, C_pad) -> (Cout, 9*C_pad)
    w_r = np.transpose(w_pad, (0, 2, 3, 1)).reshape(cout, 9 * c_pad)
    return (jnp.asarray(w_r, jnp.bfloat16),
            jnp.asarray(scale_p),
            jnp.asarray(shift_p))


@jax.jit
def dense_layer_forward(pre_features, w_r, scale_p, shift_p):
    """pre_features: list of NCHW arrays (same N, H, W).  Returns NCHW output."""
    n, _, h, w = pre_features[0].shape
    hw = h * w
    total = n * hw
    cout = int(w_r.shape[0])
    c_pad = int(scale_p.shape[0])

    chan = [int(p.shape[1]) for p in pre_features]
    slots = [_round_up8(c) for c in chan]
    slot_off = [int(x) for x in np.cumsum([0] + slots[:-1])]
    chunk_info = tuple(zip(slot_off, chan, slots))
    assert sum(slots) == c_pad

    # Static per-tap validity masks, tiled per image: 1.0 where the tap stays
    # inside H x W (trace-time numpy -> baked constant, zero per-call cost).
    ii, jj = np.meshgrid(np.arange(h), np.arange(w), indexing="ij")
    mask_np = np.zeros((9, hw), np.float32)
    t = 0
    for dy in (-1, 0, 1):
        for dx in (-1, 0, 1):
            valid = (ii + dy >= 0) & (ii + dy < h) & (jj + dx >= 0) & (jj + dx < w)
            mask_np[t] = valid.reshape(-1).astype(np.float32)
            t += 1
    mask = jnp.asarray(np.tile(mask_np, (1, n)))             # (9, N*HW)

    # NCHW -> (N, C, H*W): free reshape (channels on sublanes, spatial on lanes).
    x_chunks = [p.reshape(n, c, hw) for p, c in zip(pre_features, chan)]

    kernel = _make_kernel(chunk_info, c_pad, h, w, n)

    out_flat = pl.pallas_call(
        kernel,
        out_shape=jax.ShapeDtypeStruct((n, cout, hw), pre_features[0].dtype),
        grid_spec=pltpu.PrefetchScalarGridSpec(
            num_scalar_prefetch=0,
            grid=(1,),                                       # whole batch in one step
            in_specs=(
                [pl.BlockSpec((n, c, hw), lambda i: (0, 0, 0)) for c in chan]
                + [pl.BlockSpec((cout, 9 * c_pad), lambda i: (0, 0)),
                   pl.BlockSpec((c_pad, 1), lambda i: (0, 0)),
                   pl.BlockSpec((c_pad, 1), lambda i: (0, 0)),
                   pl.BlockSpec((9, total), lambda i: (0, 0))]),
            out_specs=pl.BlockSpec((n, cout, hw), lambda i: (0, 0, 0)),
            scratch_shapes=[
                pltpu.VMEM((c_pad, total), jnp.float32),      # BN+ReLU (concat'd, per-image lane blocks)
                pltpu.VMEM((9 * c_pad, total), jnp.bfloat16), # im2col patches (bf16)
            ]),
        compiler_params=pltpu.CompilerParams(
            dimension_semantics=("arbitrary",)),
    )(*x_chunks, w_r, scale_p, shift_p, mask)

    return out_flat.reshape(n, cout, h, w)


def _reference(pre_features, gamma, beta, running_mean, running_var, conv_w,
               eps=1e-5):
    """Plain-JAX f32 reference (matches PyTorch eval-mode semantics)."""
    x = jnp.concatenate(pre_features, axis=1)
    inv = 1.0 / jnp.sqrt(running_var + eps)
    x = (x - running_mean[None, :, None, None]) * inv[None, :, None, None]
    x = x * gamma[None, :, None, None] + beta[None, :, None, None]
    x = jnp.maximum(x, 0.0)
    return lax.conv_general_dilated(
        x, conv_w, window_strides=(1, 1), padding=((1, 1), (1, 1)),
        dimension_numbers=("NCHW", "OIHW", "NCHW"))


if __name__ == "__main__":
    key = jax.random.PRNGKey(0)
    N, H, W = 2, 16, 16
    c0, c1 = 4, 8                       # two previous feature maps
    num_input_features = c0 + c1        # 12
    growth_rate = 16
    # drop_rate = 0.0 -> dropout branch is a no-op in the PyTorch module.
    # TODO(synk): implement dropout with pltpu.prng_random_bits if drop_rate > 0.

    k = jax.random.split(key, 7)
    pre_features = [
        jax.random.normal(k[0], (N, c0, H, W), jnp.float32),
        jax.random.normal(k[1], (N, c1, H, W), jnp.float32),
    ]
    gamma = jax.random.normal(k[2], (num_input_features,), jnp.float32) * 0.1 + 1.0
    beta = jax.random.normal(k[3], (num_input_features,), jnp.float32) * 0.1
    running_mean = jax.random.normal(k[4], (num_input_features,), jnp.float32) * 0.1
    running_var = jnp.abs(jax.random.normal(k[5], (num_input_features,), jnp.float32)) * 0.1 + 1.0
    conv_w = jax.random.normal(
        k[6], (growth_rate, num_input_features, 3, 3), jnp.float32) * 0.1

    # One-time parameter prep (hoisted out of the per-forward path).
    w_r, scale_p, shift_p = prepare_dense_layer_params(
        gamma, beta, running_mean, running_var, conv_w, (c0, c1))

    out = dense_layer_forward(pre_features, w_r, scale_p, shift_p)
    out = jax.block_until_ready(out)

    ref = _reference(pre_features, gamma, beta, running_mean, running_var,
                     conv_w)
    # bf16 MXU operands (f32 accumulation) -> loosened tolerance vs f32 ref.
    np.testing.assert_allclose(np.asarray(out), np.asarray(ref),
                               rtol=2e-2, atol=2e-2)
    assert out.shape == (N, growth_rate, H, W)
    print("KERNEL_OK")
</pallas_src>

<mosaic_0001>
module attributes {stable_mosaic.version = 11 : i64} {
  func.func @kernel(%arg0: i32, %arg1: memref<2x4x256xf32, #tpu.memory_space<vmem>>, %arg2: memref<2x8x256xf32, #tpu.memory_space<vmem>>, %arg3: memref<16x144xbf16, #tpu.memory_space<vmem>>, %arg4: memref<16x1xf32, #tpu.memory_space<vmem>>, %arg5: memref<16x1xf32, #tpu.memory_space<vmem>>, %arg6: memref<9x512xf32, #tpu.memory_space<vmem>>, %arg7: memref<2x16x256xf32, #tpu.memory_space<vmem>>, %arg8: memref<16x512xf32, #tpu.memory_space<vmem>>, %arg9: memref<144x512xbf16, #tpu.memory_space<vmem>>) attributes {dimension_semantics = [#tpu.dimension_semantics<arbitrary>], iteration_bounds = array<i64: 1>, scalar_prefetch = 0 : i64, scratch_operands = 2 : i64, tpu.core_type = #tpu.core_type<tc>, window_params = [{pipeline_mode = #tpu.pipeline_mode<synchronous>, transform_indices = @transform_0, window_bounds = array<i64: 2, 4, 256>}, {pipeline_mode = #tpu.pipeline_mode<synchronous>, transform_indices = @transform_1, window_bounds = array<i64: 2, 8, 256>}, {pipeline_mode = #tpu.pipeline_mode<synchronous>, transform_indices = @transform_2, window_bounds = array<i64: 16, 144>}, {pipeline_mode = #tpu.pipeline_mode<synchronous>, transform_indices = @transform_3, window_bounds = array<i64: 16, 1>}, {pipeline_mode = #tpu.pipeline_mode<synchronous>, transform_indices = @transform_4, window_bounds = array<i64: 16, 1>}, {pipeline_mode = #tpu.pipeline_mode<synchronous>, transform_indices = @transform_5, window_bounds = array<i64: 9, 512>}, {pipeline_mode = #tpu.pipeline_mode<synchronous>, transform_indices = @transform_6, window_bounds = array<i64: 2, 16, 256>}]} {
    %cst = arith.constant 0.000000e+00 : f32
    %0 = vector.broadcast %cst : f32 to vector<4x512xf32>
    %c4 = arith.constant 4 : index
    %c0 = arith.constant 0 : index
    %1 = vector.load %arg8[%c4, %c0] : memref<16x512xf32, #tpu.memory_space<vmem>>, vector<4x512xf32>
    tpu.vector_store %arg8[%c4, %c0], %0 {strides = array<i32>} : memref<16x512xf32, #tpu.memory_space<vmem>>, vector<4x512xf32>,
    %c0_0 = arith.constant 0 : index
    %c0_1 = arith.constant 0 : index
    %2 = vector.load %arg4[%c0_0, %c0_1] : memref<16x1xf32, #tpu.memory_space<vmem>>, vector<4x1xf32>
    %c0_2 = arith.constant 0 : index
    %c0_3 = arith.constant 0 : index
    %3 = vector.load %arg5[%c0_2, %c0_3] : memref<16x1xf32, #tpu.memory_space<vmem>>, vector<4x1xf32>
    %c0_4 = arith.constant 0 : index
    %c0_5 = arith.constant 0 : index
    %c0_6 = arith.constant 0 : index
    %4 = vector.load %arg1[%c0_4, %c0_5, %c0_6] : memref<2x4x256xf32, #tpu.memory_space<vmem>>, vector<1x4x256xf32>
    %5 = vector.shape_cast %4 : vector<1x4x256xf32> to vector<4x256xf32>
    %6 = vector.broadcast %2 : vector<4x1xf32> to vector<4x256xf32>
    %7 = arith.mulf %5, %6 : vector<4x256xf32>
    %8 = vector.broadcast %3 : vector<4x1xf32> to vector<4x256xf32>
    %9 = arith.addf %7, %8 : vector<4x256xf32>
    %cst_7 = arith.constant 0.000000e+00 : f32
    %10 = vector.broadcast %cst_7 : f32 to vector<4x256xf32>
    %11 = arith.maximumf %9, %10 : vector<4x256xf32>
    %c0_8 = arith.constant 0 : index
    %c0_9 = arith.constant 0 : index
    %12 = vector.load %arg8[%c0_8, %c0_9] : memref<16x512xf32, #tpu.memory_space<vmem>>, vector<4x256xf32>
    tpu.vector_store %arg8[%c0_8, %c0_9], %11 {strides = array<i32>} : memref<16x512xf32, #tpu.memory_space<vmem>>, vector<4x256xf32>,
    %c1 = arith.constant 1 : index
    %c0_10 = arith.constant 0 : index
    %c0_11 = arith.constant 0 : index
    %13 = vector.load %arg1[%c1, %c0_10, %c0_11] : memref<2x4x256xf32, #tpu.memory_space<vmem>>, vector<1x4x256xf32>
    %14 = vector.shape_cast %13 : vector<1x4x256xf32> to vector<4x256xf32>
    %15 = vector.broadcast %2 : vector<4x1xf32> to vector<4x256xf32>
    %16 = arith.mulf %14, %15 : vector<4x256xf32>
    %17 = vector.broadcast %3 : vector<4x1xf32> to vector<4x256xf32>
    %18 = arith.addf %16, %17 : vector<4x256xf32>
    %cst_12 = arith.constant 0.000000e+00 : f32
    %19 = vector.broadcast %cst_12 : f32 to vector<4x256xf32>
    %20 = arith.maximumf %18, %19 : vector<4x256xf32>
    %c0_13 = arith.constant 0 : index
    %c256 = arith.constant 256 : index
    %21 = vector.load %arg8[%c0_13, %c256] : memref<16x512xf32, #tpu.memory_space<vmem>>, vector<4x256xf32>
    tpu.vector_store %arg8[%c0_13, %c256], %20 {strides = array<i32>} : memref<16x512xf32, #tpu.memory_space<vmem>>, vector<4x256xf32>,
    %c8 = arith.constant 8 : index
    %c0_14 = arith.constant 0 : index
    %22 = vector.load %arg4[%c8, %c0_14] : memref<16x1xf32, #tpu.memory_space<vmem>>, vector<8x1xf32>
    %c8_15 = arith.constant 8 : index
    %c0_16 = arith.constant 0 : index
    %23 = vector.load %arg5[%c8_15, %c0_16] : memref<16x1xf32, #tpu.memory_space<vmem>>, vector<8x1xf32>
    %c0_17 = arith.constant 0 : index
    %c0_18 = arith.constant 0 : index
    %c0_19 = arith.constant 0 : index
    %24 = vector.load %arg2[%c0_17, %c0_18, %c0_19] : memref<2x8x256xf32, #tpu.memory_space<vmem>>, vector<1x8x256xf32>
    %25 = vector.shape_cast %24 : vector<1x8x256xf32> to vector<8x256xf32>
    %26 = vector.broadcast %22 : vector<8x1xf32> to vector<8x256xf32>
    %27 = arith.mulf %25, %26 : vector<8x256xf32>
    %28 = vector.broadcast %23 : vector<8x1xf32> to vector<8x256xf32>
    %29 = arith.addf %27, %28 : vector<8x256xf32>
    %cst_20 = arith.constant 0.000000e+00 : f32
    %30 = vector.broadcast %cst_20 : f32 to vector<8x256xf32>
    %31 = arith.maximumf %29, %30 : vector<8x256xf32>
    %c8_21 = arith.constant 8 : index
    %c0_22 = arith.constant 0 : index
    %32 = vector.load %arg8[%c8_21, %c0_22] : memref<16x512xf32, #tpu.memory_space<vmem>>, vector<8x256xf32>
    tpu.vector_store %arg8[%c8_21, %c0_22], %31 {strides = array<i32>} : memref<16x512xf32, #tpu.memory_space<vmem>>, vector<8x256xf32>,
    %c1_23 = arith.constant 1 : index
    %c0_24 = arith.constant 0 : index
    %c0_25 = arith.constant 0 : index
    %33 = vector.load %arg2[%c1_23, %c0_24, %c0_25] : memref<2x8x256xf32, #tpu.memory_space<vmem>>, vector<1x8x256xf32>
    %34 = vector.shape_cast %33 : vector<1x8x256xf32> to vector<8x256xf32>
    %35 = vector.broadcast %22 : vector<8x1xf32> to vector<8x256xf32>
    %36 = arith.mulf %34, %35 : vector<8x256xf32>
    %37 = vector.broadcast %23 : vector<8x1xf32> to vector<8x256xf32>
    %38 = arith.addf %36, %37 : vector<8x256xf32>
    %cst_26 = arith.constant 0.000000e+00 : f32
    %39 = vector.broadcast %cst_26 : f32 to vector<8x256xf32>
    %40 = arith.maximumf %38, %39 : vector<8x256xf32>
    %c8_27 = arith.constant 8 : index
    %c256_28 = arith.constant 256 : index
    %41 = vector.load %arg8[%c8_27, %c256_28] : memref<16x512xf32, #tpu.memory_space<vmem>>, vector<8x256xf32>
    tpu.vector_store %arg8[%c8_27, %c256_28], %40 {strides = array<i32>} : memref<16x512xf32, #tpu.memory_space<vmem>>, vector<8x256xf32>,
    %c0_29 = arith.constant 0 : index
    %c0_30 = arith.constant 0 : index
    %42 = vector.load %arg8[%c0_29, %c0_30] : memref<16x512xf32, #tpu.memory_space<vmem>>, vector<16x512xf32>
    %c0_31 = arith.constant 0 : index
    %c0_32 = arith.constant 0 : index
    %43 = vector.load %arg6[%c0_31, %c0_32] : memref<9x512xf32, #tpu.memory_space<vmem>>, vector<9x512xf32>
    %c17_i32 = arith.constant 17 : i32
    %44 = tpu.dynamic_rotate %42 by %c17_i32 dim 1 : vector<16x512xf32>, i32 -> vector<16x512xf32>
    %45 = vector.extract_strided_slice %43 {offsets = [0, 0], sizes = [1, 512], strides = [1, 1]} : vector<9x512xf32> to vector<1x512xf32>
    %46 = vector.broadcast %45 : vector<1x512xf32> to vector<16x512xf32>
    %47 = arith.mulf %44, %46 : vector<16x512xf32>
    %48 = arith.truncf %47 : vector<16x512xf32> to vector<16x512xbf16>
    %c0_33 = arith.constant 0 : index
    %c0_34 = arith.constant 0 : index
    %49 = vector.load %arg9[%c0_33, %c0_34] : memref<144x512xbf16, #tpu.memory_space<vmem>>, vector<16x512xbf16>
    tpu.vector_store %arg9[%c0_33, %c0_34], %48 {strides = array<i32>} : memref<144x512xbf16, #tpu.memory_space<vmem>>, vector<16x512xbf16>,
    %c16_i32 = arith.constant 16 : i32
    %50 = tpu.dynamic_rotate %42 by %c16_i32 dim 1 : vector<16x512xf32>, i32 -> vector<16x512xf32>
    %51 = vector.extract_strided_slice %43 {offsets = [1, 0], sizes = [1, 512], strides = [1, 1]} : vector<9x512xf32> to vector<1x512xf32>
    %52 = vector.broadcast %51 : vector<1x512xf32> to vector<16x512xf32>
    %53 = arith.mulf %50, %52 : vector<16x512xf32>
    %54 = arith.truncf %53 : vector<16x512xf32> to vector<16x512xbf16>
    %c16 = arith.constant 16 : index
    %c0_35 = arith.constant 0 : index
    %55 = vector.load %arg9[%c16, %c0_35] : memref<144x512xbf16, #tpu.memory_space<vmem>>, vector<16x512xbf16>
    tpu.vector_store %arg9[%c16, %c0_35], %54 {strides = array<i32>} : memref<144x512xbf16, #tpu.memory_space<vmem>>, vector<16x512xbf16>,
    %c15_i32 = arith.constant 15 : i32
    %56 = tpu.dynamic_rotate %42 by %c15_i32 dim 1 : vector<16x512xf32>, i32 -> vector<16x512xf32>
    %57 = vector.extract_strided_slice %43 {offsets = [2, 0], sizes = [1, 512], strides = [1, 1]} : vector<9x512xf32> to vector<1x512xf32>
    %58 = vector.broadcast %57 : vector<1x512xf32> to vector<16x512xf32>
    %59 = arith.mulf %56, %58 : vector<16x512xf32>
    %60 = arith.truncf %59 : vector<16x512xf32> to vector<16x512xbf16>
    %c32 = arith.constant 32 : index
    %c0_36 = arith.constant 0 : index
    %61 = vector.load %arg9[%c32, %c0_36] : memref<144x512xbf16, #tpu.memory_space<vmem>>, vector<16x512xbf16>
    tpu.vector_store %arg9[%c32, %c0_36], %60 {strides = array<i32>} : memref<144x512xbf16, #tpu.memory_space<vmem>>, vector<16x512xbf16>,
    %c1_i32 = arith.constant 1 : i32
    %62 = tpu.dynamic_rotate %42 by %c1_i32 dim 1 : vector<16x512xf32>, i32 -> vector<16x512xf32>
    %63 = vector.extract_strided_slice %43 {offsets = [3, 0], sizes = [1, 512], strides = [1, 1]} : vector<9x512xf32> to vector<1x512xf32>
    %64 = vector.broadcast %63 : vector<1x512xf32> to vector<16x512xf32>
    %65 = arith.mulf %62, %64 : vector<16x512xf32>
    %66 = arith.truncf %65 : vector<16x512xf32> to vector<16x512xbf16>
    %c48 = arith.constant 48 : index
    %c0_37 = arith.constant 0 : index
    %67 = vector.load %arg9[%c48, %c0_37] : memref<144x512xbf16, #tpu.memory_space<vmem>>, vector<16x512xbf16>
    tpu.vector_store %arg9[%c48, %c0_37], %66 {strides = array<i32>} : memref<144x512xbf16, #tpu.memory_space<vmem>>, vector<16x512xbf16>,
    %68 = arith.truncf %42 : vector<16x512xf32> to vector<16x512xbf16>
    %c64 = arith.constant 64 : index
    %c0_38 = arith.constant 0 : index
    %69 = vector.load %arg9[%c64, %c0_38] : memref<144x512xbf16, #tpu.memory_space<vmem>>, vector<16x512xbf16>
    tpu.vector_store %arg9[%c64, %c0_38], %68 {strides = array<i32>} : memref<144x512xbf16, #tpu.memory_space<vmem>>, vector<16x512xbf16>,
    %c511_i32 = arith.constant 511 : i32
    %70 = tpu.dynamic_rotate %42 by %c511_i32 dim 1 : vector<16x512xf32>, i32 -> vector<16x512xf32>
    %71 = vector.extract_strided_slice %43 {offsets = [5, 0], sizes = [1, 512], strides = [1, 1]} : vector<9x512xf32> to vector<1x512xf32>
    %72 = vector.broadcast %71 : vector<1x512xf32> to vector<16x512xf32>
    %73 = arith.mulf %70, %72 : vector<16x512xf32>
    %74 = arith.truncf %73 : vector<16x512xf32> to vector<16x512xbf16>
    %c80 = arith.constant 80 : index
    %c0_39 = arith.constant 0 : index
    %75 = vector.load %arg9[%c80, %c0_39] : memref<144x512xbf16, #tpu.memory_space<vmem>>, vector<16x512xbf16>
    tpu.vector_store %arg9[%c80, %c0_39], %74 {strides = array<i32>} : memref<144x512xbf16, #tpu.memory_space<vmem>>, vector<16x512xbf16>,
    %c497_i32 = arith.constant 497 : i32
    %76 = tpu.dynamic_rotate %42 by %c497_i32 dim 1 : vector<16x512xf32>, i32 -> vector<16x512xf32>
    %77 = vector.extract_strided_slice %43 {offsets = [6, 0], sizes = [1, 512], strides = [1, 1]} : vector<9x512xf32> to vector<1x512xf32>
    %78 = vector.broadcast %77 : vector<1x512xf32> to vector<16x512xf32>
    %79 = arith.mulf %76, %78 : vector<16x512xf32>
    %80 = arith.truncf %79 : vector<16x512xf32> to vector<16x512xbf16>
    %c96 = arith.constant 96 : index
    %c0_40 = arith.constant 0 : index
    %81 = vector.load %arg9[%c96, %c0_40] : memref<144x512xbf16, #tpu.memory_space<vmem>>, vector<16x512xbf16>
    tpu.vector_store %arg9[%c96, %c0_40], %80 {strides = array<i32>} : memref<144x512xbf16, #tpu.memory_space<vmem>>, vector<16x512xbf16>,
    %c496_i32 = arith.constant 496 : i32
    %82 = tpu.dynamic_rotate %42 by %c496_i32 dim 1 : vector<16x512xf32>, i32 -> vector<16x512xf32>
    %83 = vector.extract_strided_slice %43 {offsets = [7, 0], sizes = [1, 512], strides = [1, 1]} : vector<9x512xf32> to vector<1x512xf32>
    %84 = vector.broadcast %83 : vector<1x512xf32> to vector<16x512xf32>
    %85 = arith.mulf %82, %84 : vector<16x512xf32>
    %86 = arith.truncf %85 : vector<16x512xf32> to vector<16x512xbf16>
    %c112 = arith.constant 112 : index
    %c0_41 = arith.constant 0 : index
    %87 = vector.load %arg9[%c112, %c0_41] : memref<144x512xbf16, #tpu.memory_space<vmem>>, vector<16x512xbf16>
    tpu.vector_store %arg9[%c112, %c0_41], %86 {strides = array<i32>} : memref<144x512xbf16, #tpu.memory_space<vmem>>, vector<16x512xbf16>,
    %c495_i32 = arith.constant 495 : i32
    %88 = tpu.dynamic_rotate %42 by %c495_i32 dim 1 : vector<16x512xf32>, i32 -> vector<16x512xf32>
    %89 = vector.extract_strided_slice %43 {offsets = [8, 0], sizes = [1, 512], strides = [1, 1]} : vector<9x512xf32> to vector<1x512xf32>
    %90 = vector.broadcast %89 : vector<1x512xf32> to vector<16x512xf32>
    %91 = arith.mulf %88, %90 : vector<16x512xf32>
    %92 = arith.truncf %91 : vector<16x512xf32> to vector<16x512xbf16>
    %c128 = arith.constant 128 : index
    %c0_42 = arith.constant 0 : index
    %93 = vector.load %arg9[%c128, %c0_42] : memref<144x512xbf16, #tpu.memory_space<vmem>>, vector<16x512xbf16>
    tpu.vector_store %arg9[%c128, %c0_42], %92 {strides = array<i32>} : memref<144x512xbf16, #tpu.memory_space<vmem>>, vector<16x512xbf16>,
    %c0_43 = arith.constant 0 : index
    %c0_44 = arith.constant 0 : index
    %94 = vector.load %arg3[%c0_43, %c0_44] : memref<16x144xbf16, #tpu.memory_space<vmem>>, vector<16x144xbf16>
    %c0_45 = arith.constant 0 : index
    %c0_46 = arith.constant 0 : index
    %95 = vector.load %arg9[%c0_45, %c0_46] : memref<144x512xbf16, #tpu.memory_space<vmem>>, vector<144x512xbf16>
    %cst_47 = arith.constant dense<0.000000e+00> : vector<16x512xf32>
    %96 = tpu.matmul %94, %95, %cst_47 {dimension_numbers = #tpu.dot_dimension_numbers<[1], [0], [0], [1], [0, 0, 1, 1], [], []>} : vector<16x144xbf16>, vector<144x512xbf16>, vector<16x512xf32> -> vector<16x512xf32>
    %97 = vector.extract_strided_slice %96 {offsets = [0, 0], sizes = [16, 256], strides = [1, 1]} : vector<16x512xf32> to vector<16x256xf32>
    %c0_48 = arith.constant 0 : index
    %c0_49 = arith.constant 0 : index
    %c0_50 = arith.constant 0 : index
    %98 = vector.load %arg7[%c0_48, %c0_49, %c0_50] : memref<2x16x256xf32, #tpu.memory_space<vmem>>, vector<1x16x256xf32>
    %99 = vector.shape_cast %98 : vector<1x16x256xf32> to vector<16x256xf32>
    %100 = vector.shape_cast %97 : vector<16x256xf32> to vector<1x16x256xf32>
    tpu.vector_store %arg7[%c0_48, %c0_49, %c0_50], %100 {strides = array<i32>} : memref<2x16x256xf32, #tpu.memory_space<vmem>>, vector<1x16x256xf32>,
    %101 = vector.extract_strided_slice %96 {offsets = [0, 256], sizes = [16, 256], strides = [1, 1]} : vector<16x512xf32> to vector<16x256xf32>
    %c1_51 = arith.constant 1 : index
    %c0_52 = arith.constant 0 : index
    %c0_53 = arith.constant 0 : index
    %102 = vector.load %arg7[%c1_51, %c0_52, %c0_53] : memref<2x16x256xf32, #tpu.memory_space<vmem>>, vector<1x16x256xf32>
    %103 = vector.shape_cast %102 : vector<1x16x256xf32> to vector<16x256xf32>
    %104 = vector.shape_cast %101 : vector<16x256xf32> to vector<1x16x256xf32>
    tpu.vector_store %arg7[%c1_51, %c0_52, %c0_53], %104 {strides = array<i32>} : memref<2x16x256xf32, #tpu.memory_space<vmem>>, vector<1x16x256xf32>,
    return
  }
  func.func @transform_0(%arg0: i32) -> (i32, i32, i32) {
    %c0_i32 = arith.constant 0 : i32
    %c0_i32_0 = arith.constant 0 : i32
    %c0_i32_1 = arith.constant 0 : i32
    %c0_i32_2 = arith.constant 0 : i32
    return %c0_i32, %c0_i32_0, %c0_i32_1 : i32, i32, i32
  }
  func.func @transform_1(%arg0: i32) -> (i32, i32, i32) {
    %c0_i32 = arith.constant 0 : i32
    %c0_i32_0 = arith.constant 0 : i32
    %c0_i32_1 = arith.constant 0 : i32
    %c0_i32_2 = arith.constant 0 : i32
    return %c0_i32, %c0_i32_0, %c0_i32_1 : i32, i32, i32
  }
  func.func @transform_2(%arg0: i32) -> (i32, i32) {
    %c0_i32 = arith.constant 0 : i32
    %c0_i32_0 = arith.constant 0 : i32
    %c0_i32_1 = arith.constant 0 : i32
    return %c0_i32, %c0_i32_0 : i32, i32
  }
  func.func @transform_3(%arg0: i32) -> (i32, i32) {
    %c0_i32 = arith.constant 0 : i32
    %c0_i32_0 = arith.constant 0 : i32
    %c0_i32_1 = arith.constant 0 : i32
    return %c0_i32, %c0_i32_0 : i32, i32
  }
  func.func @transform_4(%arg0: i32) -> (i32, i32) {
    %c0_i32 = arith.constant 0 : i32
    %c0_i32_0 = arith.constant 0 : i32
    %c0_i32_1 = arith.constant 0 : i32
    return %c0_i32, %c0_i32_0 : i32, i32
  }
  func.func @transform_5(%arg0: i32) -> (i32, i32) {
    %c0_i32 = arith.constant 0 : i32
    %c0_i32_0 = arith.constant 0 : i32
    %c0_i32_1 = arith.constant 0 : i32
    return %c0_i32, %c0_i32_0 : i32, i32
  }
  func.func @transform_6(%arg0: i32) -> (i32, i32, i32) {
    %c0_i32 = arith.constant 0 : i32
    %c0_i32_0 = arith.constant 0 : i32
    %c0_i32_1 = arith.constant 0 : i32
    %c0_i32_2 = arith.constant 0 : i32
    return %c0_i32, %c0_i32_0, %c0_i32_1 : i32, i32, i32
  }
}

</mosaic_0001>

<bundles_post_ra>
// kernel: dense_layer_forward.1
= control target key start
LH: loop header
LB: loop body
LE: loop exit
PB: predicated region body
PF: predicated region fallthrough
CT: control target
= control target key end

     0   :  { %v1066_v0 = vmov 0   ;;  %v1067_v5 = vmov 839922192   ;;  %v1068_v7 = vmov 0.0   ;;  %s1069_s14 = smov 112   ;;  %s1071_s15 = smov 127   ;;  %v138_v53 = vlaneseq  ;;  %s1741_s3 = inlined_call_operand.vmem [shape: f32[16,1], index: 3, kind: input, shape index: {}]   ;;  %s1742_s4 = inlined_call_operand.vmem [shape: f32[16,1], index: 4, kind: input, shape index: {}]   ;;  %s1743_s5 = inlined_call_operand.vmem [shape: f32[9,512], index: 5, kind: input, shape index: {}]   ;;  %s1744_s1 = inlined_call_operand.vmem [shape: f32[2,8,256], index: 1, kind: input, shape index: {}]   ;;  %s1745_s0 = inlined_call_operand.vmem [shape: f32[2,4,256], index: 0, kind: input, shape index: {}]   ;;  %s1746_s2 = inlined_call_operand.vmem [shape: bf16[16,144], index: 2, kind: input, shape index: {}]   ;;  %s1747_s6 = inlined_call_operand.vmem [shape: f32[2,16,256], index: 6, kind: output, shape index: {}]  }
   0x1   :  { %1061 = vset.pattern.permute.xlu1 %v1066_v0  ;;  %1060 = vset.pattern.permute.xlu0 %v1066_v0  ;;  %v73_v1 = vld [vmem:[%s1741_s3 + $0x8] sm:$0xff]  ;;  %v28_v2 = vld [vmem:[%s1741_s3] sm:$0xf]  ;;  %v36_v6 = vunpack.c.l.s4 %v1067_v5  ;;  %25 = vst [vmem:[#allocation2] sm:$0xf0] %v1068_v7  ;;  %v849_v13 = vld [vmem:[%s1744_s1 + $0x10] sm:$0xff] }
   0x2   :  { %79 = vperm.xlu1 %1061, %v73_v1   ;;  %33 = vperm.xlu0 %1060, %v28_v2   ;;  %v74_v3 = vld [vmem:[%s1742_s4 + $0x8] sm:$0xff]  ;;  %v29_v4 = vld [vmem:[%s1742_s4] sm:$0xf]  ;;  %24 = vst [vmem:[#allocation2 + $0x30] sm:$0xf0] %v1068_v7  ;;  %v850_v14 = vld [vmem:[%s1744_s1 + $0x18] sm:$0xff] }
   0x3   :  { %26 = vst [vmem:[#allocation2 + $0x18] sm:$0xf0] %v1068_v7  ;;  %v37_v9 = vunpack.c.0.s8 %v36_v6  ;;  %v75_v11 = vld [vmem:[%s1744_s1] sm:$0xff]  ;;  %v76_v12 = vld [vmem:[%s1744_s1 + $0x8] sm:$0xff]  ;;  %s1072_s16 = smov 1   ;;  %s1073_s17 = smov 15  }
   0x4   :  { %27 = vst [vmem:[#allocation2 + $0x10] sm:$0xf0] %v1068_v7  ;;  %v30_v16 = vld [vmem:[%s1745_s0] sm:$0xff]  ;;  %v848_v33 = vld [vmem:[%s1745_s0 + $0x8] sm:$0xff]  ;;  %s1070_s0 = smov 113   ;;  %s1074_s18 = smov 16  }
   0x5   :  { %s1075_s19 = smov 17   ;;  %s1076_s20 = smov 111   ;;  %v1244_v55 = vand.u32 127, %v138_v53  ;;  %v1249_v56 = vld [vmem:[%s1743_s5] sm:$0xff]  ;;  %v1254_v57 = vld [vmem:[%s1743_s5 + $0x8] sm:$0xff]  ;;  %v1280_v5 = vld [vmem:[%s1743_s5 + $0x18] sm:$0xff] }
   0x6   :  { %v427_v58 = vperm.slane %v1249_v56, 7  ;;  %v428_v59 = vperm.slane %v1254_v57, 7  ;;  %v382_v6 = vperm.slane %v1249_v56, 6  ;;  %v383_v7 = vperm.slane %v1254_v57, 6 }
   0x7   :  { %vm418_vm0 = vcmp.lt.s32.totalorder %v1244_v55, 112  ;;  %vm373_vm1 = vcmp.lt.s32.totalorder %v1244_v55, 113  ;;  %vm328_vm2 = vcmp.lt.s32.totalorder %v1244_v55, 127  ;;  %vm275_vm3 = vcmp.lt.s32.totalorder %v1244_v55, 1 }
   0x8   :  { %vm230_vm4 = vcmp.lt.s32.totalorder %v1244_v55, 15  ;;  %vm185_vm5 = vcmp.lt.s32.totalorder %v1244_v55, 16  ;;  %vm140_vm6 = vcmp.lt.s32.totalorder %v1244_v55, 17  ;;  %vm463_vm7 = vcmp.lt.s32.totalorder %v1244_v55, 111 }
   0x9   :  { %vm719_vm8 = vcmask 130048  }
   0xa   :  { %86 = vperm.xlu1 %1061, %v74_v3   ;;  %43 = vperm.xlu0 %1060, %v29_v4   ;;  %v1275_v4 = vld [vmem:[%s1743_s5 + $0x10] sm:$0xff] }
  0x74   :  { %v80_v8 = vpop.permute.xlu1 %79  ;;  %v34_v10 = vpop.permute.xlu0 %33 }
  0x75   :  { %v38_v15 = vperm.slane %v34_v10, %v37_v9  ;;  %v82_v17 = vmul.f32 %v80_v8, %v75_v11  ;;  %v83_v18 = vmul.f32 %v80_v8, %v76_v12  ;;  %v98_v19 = vmul.f32 %v849_v13, %v80_v8 }
  0x76   :  { %v99_v20 = vmul.f32 %v850_v14, %v80_v8  ;;  %v429_v8 = vperm.slane %v1275_v4, 7 }
  0x77   :  { %v40_v21 = vmul.f32 %v38_v15, %v30_v16  ;;  %v62_v37 = vmul.f32 %v848_v33, %v38_v15 }
  0x7c   :  { %v87_v22 = vpop.permute.xlu1 %86  ;;  %v44_v23 = vpop.permute.xlu0 %43 }
  0x7d   :  { %v89_v24 = vadd.f32 %v87_v22, %v82_v17  ;;  %v90_v25 = vadd.f32 %v87_v22, %v83_v18  ;;  %v100_v26 = vadd.f32 %v98_v19, %v87_v22  ;;  %v101_v27 = vadd.f32 %v99_v20, %v87_v22 }
  0x7e   :  { %v48_v28 = vperm.slane %v44_v23, %v37_v9  ;;  %v430_v9 = vperm.slane %v1280_v5, 7  ;;  %v337_v23 = vperm.slane %v1249_v56, 5 }
  0x7f   :  { %v1139_v29 = vmax.f32 %v89_v24, 0.0  ;;  %v1141_v30 = vmax.f32 %v90_v25, 0.0  ;;  %v1143_v31 = vmax.f32 %v100_v26, 0.0  ;;  %v1145_v32 = vmax.f32 %v101_v27, 0.0 }
  0x80   :  { %v50_v34 = vadd.f32 %v48_v28, %v40_v21  ;;  %v63_v39 = vadd.f32 %v62_v37, %v48_v28  ;;  %v338_v24 = vperm.slane %v1254_v57, 5  ;;  %v285_v37 = vperm.slane %v1254_v57, 3 }
  0x81   :  { %412 = vrot.lane.b32.xlu0 %v1143_v31, %s1069_s14  ;;  %408 = vrot.lane.b32.xlu1 %v1141_v30, %s1069_s14  ;;  %v306_v36 = vpack.c.bf16 %v1141_v30, %v1139_v29  ;;  %v307_v38 = vpack.c.bf16 %v1145_v32, %v1143_v31 }
  0x82   :  { %v51_v35 = vmax.f32 %v50_v34, 0.0  ;;  %404 = vrot.lane.b32.xlu2 %v1139_v29, %s1069_s14  ;;  %v64_v40 = vmax.f32 %v63_v39, 0.0 }
  0x83   :  { %310 = vst [vmem:[#allocation3 + $0x90] sm:$0xff] %v306_v36  ;;  %v284_v36 = vperm.slane %v1249_v56, 3 }
  0x84   :  { %53 = vst [vmem:[#allocation1] ss:$2 sm:$0xff] %v51_v35 }
  0x85   :  { %311 = vst [vmem:[#allocation3 + $0x98] sm:$0xff] %v307_v38 }
  0x89   :  { %367 = vrot.lane.b32.xlu0 %v1143_v31, %s1070_s0  ;;  %363 = vrot.lane.b32.xlu1 %v1141_v30, %s1070_s0 }
  0x8a   :  { %359 = vrot.lane.b32.xlu2 %v1139_v29, %s1070_s0 }
  0x8b   :  { %v54_v41 = vld.sshfl [vmem:[#allocation1] sm:$0xff pattern:$0x75316420]  ;;  %v55_v42 = vld.sshfl [vmem:[#allocation1 + $0x8] sm:$0xff pattern:$0x75316420] }
  0x8c   :  { %58 = vst [vmem:[#allocation2 + $0x30] sm:$0xf] %v54_v41 }
  0x8d   :  { %59 = vst [vmem:[#allocation2] sm:$0xf] %v55_v42 }
  0x8e   :  { %66 = vst [vmem:[#allocation1] ss:$2 sm:$0xff] %v64_v40 }
  0x91   :  { %322 = vrot.lane.b32.xlu0 %v1143_v31, %s1071_s15  ;;  %318 = vrot.lane.b32.xlu1 %v1141_v30, %s1071_s15 }
  0x92   :  { %314 = vrot.lane.b32.xlu2 %v1139_v29, %s1071_s15 }
  0x93   :  { %v106_v43 = vld [vmem:[#allocation2 + $0x30] sm:$0xff] }
  0x94   :  { %v1172_v44 = vld [vmem:[#allocation2] sm:$0xff] }
  0x95   :  { %v67_v45 = vld.sshfl [vmem:[#allocation1] sm:$0xff pattern:$0x75316420]  ;;  %v68_v46 = vld.sshfl [vmem:[#allocation1 + $0x8] sm:$0xff pattern:$0x75316420]  ;;  %v304_v47 = vpack.c.bf16 %v1172_v44, %v106_v43 }
  0x96   :  { %71 = vst [vmem:[#allocation2 + $0x18] sm:$0xf] %v67_v45 }
  0x97   :  { %72 = vst [vmem:[#allocation2 + $0x10] sm:$0xf] %v68_v46  ;;  %v239_v46 = vperm.slane %v1249_v56, 2 }
  0x98   :  { %308 = vst [vmem:[#allocation3 + $0x80] sm:$0xff] %v304_v47  ;;  %v240_v47 = vperm.slane %v1254_v57, 2 }
  0x99   :  { %273 = vrot.lane.b32.xlu0 %v1145_v32, %s1072_s16  ;;  %265 = vrot.lane.b32.xlu1 %v1141_v30, %s1072_s16 }
  0x9a   :  { %261 = vrot.lane.b32.xlu2 %v1139_v29, %s1072_s16 }
  0x9d   :  { %v1181_v48 = vld [vmem:[#allocation2 + $0x18] sm:$0xff] }
  0x9e   :  { %v1183_v49 = vld [vmem:[#allocation2 + $0x10] sm:$0xff] }
  0x9f   :  { %v305_v50 = vpack.c.bf16 %v1183_v49, %v1181_v48 }
  0xa1   :  { %220 = vrot.lane.b32.xlu0 %v1141_v30, %s1073_s17  ;;  %216 = vrot.lane.b32.xlu1 %v1139_v29, %s1073_s17  ;;  %309 = vst [vmem:[#allocation3 + $0x88] sm:$0xff] %v305_v50 }
  0xa2   :  { %416 = vrot.lane.b32.xlu2 %v1145_v32, %s1069_s14 }
  0xa9   :  { %171 = vrot.lane.b32.xlu0 %v1139_v29, %s1074_s18  ;;  %371 = vrot.lane.b32.xlu1 %v1145_v32, %s1070_s0 }
  0xaa   :  { %228 = vrot.lane.b32.xlu2 %v1145_v32, %s1073_s17 }
  0xb1   :  { %326 = vrot.lane.b32.xlu0 %v1145_v32, %s1071_s15  ;;  %183 = vrot.lane.b32.xlu1 %v1145_v32, %s1074_s18 }
  0xb2   :  { %175 = vrot.lane.b32.xlu2 %v1141_v30, %s1074_s18 }
  0xb9   :  { %136 = vrot.lane.b32.xlu0 %v1145_v32, %s1075_s19  ;;  %128 = vrot.lane.b32.xlu1 %v1141_v30, %s1075_s19 }
  0xba   :  { %124 = vrot.lane.b32.xlu2 %v1139_v29, %s1075_s19 }
  0xc1   :  { %457 = vrot.lane.b32.xlu1 %v1143_v31, %s1076_s20  ;;  %406 = vrot.lane.b32.xlu0 %v1172_v44, %s1069_s14 }
  0xc2   :  { %449 = vrot.lane.b32.xlu2 %v1139_v29, %s1076_s20 }
  0xc9   :  { %361 = vrot.lane.b32.xlu0 %v1172_v44, %s1070_s0  ;;  %357 = vrot.lane.b32.xlu1 %v106_v43, %s1070_s0 }
  0xca   :  { %402 = vrot.lane.b32.xlu2 %v106_v43, %s1069_s14 }
  0xd1   :  { %316 = vrot.lane.b32.xlu0 %v1172_v44, %s1071_s15  ;;  %312 = vrot.lane.b32.xlu1 %v106_v43, %s1071_s15 }
  0xd2   :  { %218 = vrot.lane.b32.xlu2 %v1172_v44, %s1073_s17 }
  0xd9   :  { %263 = vrot.lane.b32.xlu0 %v1172_v44, %s1072_s16  ;;  %259 = vrot.lane.b32.xlu1 %v106_v43, %s1072_s16 }
  0xda   :  { %169 = vrot.lane.b32.xlu2 %v106_v43, %s1074_s18 }
  0xdc   :  { %v405_v51 = vpop.permute.xlu2 %404 }
  0xe1   :  { %214 = vrot.lane.b32.xlu0 %v106_v43, %s1073_s17  ;;  %173 = vrot.lane.b32.xlu1 %v1172_v44, %s1074_s18 }
  0xe2   :  { %410 = vrot.lane.b32.xlu2 %v1181_v48, %s1069_s14 }
  0xe4   :  { %v1235_v52 = vpop.permute.xlu2 %359 }
  0xe9   :  { %126 = vrot.lane.b32.xlu0 %v1172_v44, %s1075_s19  ;;  %122 = vrot.lane.b32.xlu1 %v106_v43, %s1075_s19 }
  0xea   :  { %365 = vrot.lane.b32.xlu2 %v1181_v48, %s1070_s0 }
  0xec   :  { %v1242_v54 = vpop.permute.xlu2 %314 }
  0xf1   :  { %369 = vrot.lane.b32.xlu0 %v1183_v49, %s1070_s0  ;;  %447 = vrot.lane.b32.xlu1 %v106_v43, %s1076_s20 }
  0xf2   :  { %320 = vrot.lane.b32.xlu2 %v1181_v48, %s1071_s15 }
  0xf3   :  { %v413_v60 = vpop.permute.xlu0 %412  ;;  %v409_v61 = vpop.permute.xlu1 %408 }
  0xf4   :  { %v422_v62 = vsel %vm418_vm0, %v409_v61, %v413_v60  ;;  %v424_v63 = vsel %vm418_vm0, %v405_v51, %v409_v61  ;;  %v262_v0 = vpop.permute.xlu2 %261 }
  0xf5   :  { %v435_v1 = vmul.f32 %v427_v58, %v424_v63  ;;  %v436_v2 = vmul.f32 %v428_v59, %v422_v62  ;;  %v385_v63 = vperm.slane %v1280_v5, 6 }
  0xf7   :  { %v441_v3 = vpack.c.bf16 %v436_v2, %v435_v1 }
  0xf9   :  { %445 = vst [vmem:[#allocation3 + $0xf0] sm:$0xff] %v441_v3  ;;  %181 = vrot.lane.b32.xlu0 %v1183_v49, %s1074_s18  ;;  %414 = vrot.lane.b32.xlu1 %v1183_v49, %s1069_s14 }
  0xfa   :  { %271 = vrot.lane.b32.xlu2 %v1183_v49, %s1072_s16 }
  0xfb   :  { %v1293_v10 = vpop.permute.xlu0 %367  ;;  %v364_v11 = vpop.permute.xlu1 %363 }
  0xfc   :  { %v377_v12 = vsel %vm373_vm1, %v364_v11, %v1293_v10  ;;  %v379_v13 = vsel %vm373_vm1, %v1235_v52, %v364_v11  ;;  %v417_v14 = vpop.permute.xlu2 %416 }
  0xfd   :  { %v390_v15 = vmul.f32 %v382_v6, %v379_v13  ;;  %v391_v16 = vmul.f32 %v383_v7, %v377_v12  ;;  %v420_v17 = vsel %vm418_vm0, %v413_v60, %v417_v14  ;;  %v426_v18 = vsel %vm418_vm0, %v417_v14, %v405_v51 }
  0xfe   :  { %v437_v19 = vmul.f32 %v429_v8, %v420_v17  ;;  %v438_v20 = vmul.f32 %v430_v9, %v426_v18 }
  0xff   :  { %v396_v21 = vpack.c.bf16 %v391_v16, %v390_v15  ;;  %v195_v15 = vperm.slane %v1254_v57, 1  ;;  %v194_v16 = vperm.slane %v1249_v56, 1 }
 0x100   :  { %v442_v22 = vpack.c.bf16 %v438_v20, %v437_v19 }
 0x101   :  { %400 = vst [vmem:[#allocation3 + $0xd0] sm:$0xff] %v396_v21  ;;  %455 = vrot.lane.b32.xlu0 %v1181_v48, %s1076_s20  ;;  %226 = vrot.lane.b32.xlu1 %v1183_v49, %s1073_s17 }
 0x102   :  { %446 = vst [vmem:[#allocation3 + $0xf8] sm:$0xff] %v442_v22  ;;  %324 = vrot.lane.b32.xlu2 %v1183_v49, %s1071_s15 }
 0x103   :  { %v1322_v25 = vpop.permute.xlu0 %322  ;;  %v319_v26 = vpop.permute.xlu1 %318 }
 0x104   :  { %v332_v27 = vsel %vm328_vm2, %v319_v26, %v1322_v25  ;;  %v334_v28 = vsel %vm328_vm2, %v1242_v54, %v319_v26  ;;  %v1330_v29 = vpop.permute.xlu2 %228 }
 0x105   :  { %v345_v33 = vmul.f32 %v337_v23, %v334_v28  ;;  %v346_v34 = vmul.f32 %v338_v24, %v332_v27 }
 0x107   :  { %v351_v35 = vpack.c.bf16 %v346_v34, %v345_v33  ;;  %v149_v34 = vperm.slane %v1249_v56, 0  ;;  %v241_v56 = vperm.slane %v1275_v4, 2 }
 0x109   :  { %355 = vst [vmem:[#allocation3 + $0xb0] sm:$0xff] %v351_v35  ;;  %461 = vrot.lane.b32.xlu0 %v1145_v32, %s1076_s20  ;;  %267 = vrot.lane.b32.xlu1 %v1181_v48, %s1072_s16  ;;  %v150_v35 = vperm.slane %v1254_v57, 0 }
 0x10a   :  { %134 = vrot.lane.b32.xlu2 %v1183_v49, %s1075_s19 }
 0x10b   :  { %v1345_v38 = vpop.permute.xlu0 %273  ;;  %v1347_v39 = vpop.permute.xlu1 %265 }
 0x10c   :  { %v283_v32 = vsel %vm275_vm3, %v1345_v38, %v262_v0  ;;  %v281_v40 = vsel %vm275_vm3, %v262_v0, %v1347_v39  ;;  %v1355_v41 = vpop.permute.xlu2 %175 }
 0x10d   :  { %v292_v42 = vmul.f32 %v284_v36, %v283_v32  ;;  %v293_v43 = vmul.f32 %v285_v37, %v281_v40 }
 0x10f   :  { %v298_v45 = vpack.c.bf16 %v293_v43, %v292_v42 }
 0x111   :  { %302 = vst [vmem:[#allocation3 + $0x70] sm:$0xff] %v298_v45  ;;  %451 = vrot.lane.b32.xlu0 %v1172_v44, %s1076_s20  ;;  %453 = vrot.lane.b32.xlu1 %v1141_v30, %s1076_s20 }
 0x112   :  { %459 = vrot.lane.b32.xlu2 %v1183_v49, %s1076_s20  ;;  %v384_v49 = vperm.slane %v1275_v4, 6 }
 0x113   :  { %v1370_v50 = vpop.permute.xlu0 %220  ;;  %v217_v51 = vpop.permute.xlu1 %216 }
 0x114   :  { %v236_v53 = vsel %vm230_vm4, %v217_v51, %v1370_v50  ;;  %v238_v30 = vsel %vm230_vm4, %v1330_v29, %v217_v51  ;;  %v125_v44 = vpop.permute.xlu2 %124 }
 0x115   :  { %v247_v60 = vmul.f32 %v239_v46, %v238_v30  ;;  %v248_v61 = vmul.f32 %v240_v47, %v236_v53 }
 0x117   :  { %v253_v62 = vpack.c.bf16 %v248_v61, %v247_v60 }
 0x119   :  { %257 = vst [vmem:[#allocation3 + $0x50] sm:$0xff] %v253_v62  ;;  %224 = vrot.lane.b32.xlu0 %v1143_v31, %s1073_s17  ;;  %177 = vrot.lane.b32.xlu1 %v1181_v48, %s1074_s18 }
 0x11a   :  { %269 = vrot.lane.b32.xlu2 %v1143_v31, %s1072_s16 }
 0x11b   :  { %v172_v0 = vpop.permute.xlu0 %171  ;;  %v372_v1 = vpop.permute.xlu1 %371 }
 0x11c   :  { %v375_v2 = vsel %vm373_vm1, %v1293_v10, %v372_v1  ;;  %v381_v3 = vsel %vm373_vm1, %v372_v1, %v1235_v52  ;;  %v1396_v11 = vpop.permute.xlu2 %449  ;;  %v339_v52 = vperm.slane %v1275_v4, 5  ;;  %v340_v10 = vperm.slane %v1280_v5, 5 }
 0x11d   :  { %v392_v12 = vmul.f32 %v384_v49, %v375_v2  ;;  %v393_v13 = vmul.f32 %v385_v63, %v381_v3  ;;  %v191_v17 = vsel %vm185_vm5, %v172_v0, %v1355_v41 }
 0x11f   :  { %v397_v14 = vpack.c.bf16 %v393_v13, %v392_v12 }
 0x121   :  { %401 = vst [vmem:[#allocation3 + $0xd8] sm:$0xff] %v397_v14  ;;  %130 = vrot.lane.b32.xlu0 %v1181_v48, %s1075_s19  ;;  %132 = vrot.lane.b32.xlu1 %v1143_v31, %s1075_s19 }
 0x122   :  { %222 = vrot.lane.b32.xlu2 %v1181_v48, %s1073_s17  ;;  %v203_v48 = vmul.f32 %v195_v15, %v191_v17 }
 0x123   :  { %v327_v18 = vpop.permute.xlu0 %326  ;;  %v1416_v19 = vpop.permute.xlu1 %183 }
 0x124   :  { %v330_v20 = vsel %vm328_vm2, %v1322_v25, %v327_v18  ;;  %v336_v21 = vsel %vm328_vm2, %v327_v18, %v1242_v54  ;;  %v193_v22 = vsel %vm185_vm5, %v1416_v19, %v172_v0  ;;  %v1427_v26 = vpop.permute.xlu2 %402 }
 0x125   :  { %v347_v27 = vmul.f32 %v339_v52, %v330_v20  ;;  %v348_v28 = vmul.f32 %v340_v10, %v336_v21  ;;  %v202_v25 = vmul.f32 %v194_v16, %v193_v22 }
 0x127   :  { %v352_v33 = vpack.c.bf16 %v348_v28, %v347_v27  ;;  %v208_v54 = vpack.c.bf16 %v203_v48, %v202_v25  ;;  %v1043_v48 = vld [vmem:[#allocation3 + $0xec] sm:$0xf0]  ;;  %v975_v25 = vld [vmem:[#allocation3 + $0xf0] sm:$0xf0] }
 0x129   :  { %356 = vst [vmem:[#allocation3 + $0xb8] sm:$0xff] %v352_v33 }
 0x12a   :  { %212 = vst [vmem:[#allocation3 + $0x30] sm:$0xff] %v208_v54  ;;  %179 = vrot.lane.b32.xlu2 %v1143_v31, %s1074_s18 }
 0x12b   :  { %v1442_v32 = vpop.permute.xlu0 %136  ;;  %v1444_v40 = vpop.permute.xlu1 %128 }
 0x12c   :  { %v148_v42 = vsel %vm140_vm6, %v1442_v32, %v125_v44  ;;  %v146_v43 = vsel %vm140_vm6, %v125_v44, %v1444_v40  ;;  %v1452_v45 = vpop.permute.xlu2 %218 }
 0x12d   :  { %v157_v51 = vmul.f32 %v149_v34, %v148_v42  ;;  %v158_v31 = vmul.f32 %v150_v35, %v146_v43 }
 0x12f   :  { %v163_v53 = vpack.c.bf16 %v158_v31, %v157_v51 }
 0x131   :  { %167 = vst [vmem:[#allocation3 + $0x10] sm:$0xff] %v163_v53 }
 0x133   :  { %v1458_v30 = vpop.permute.xlu1 %457  ;;  %v407_v60 = vpop.permute.xlu0 %406 }
 0x134   :  { %v1460_v61 = vpop.permute.xlu2 %169  ;;  %v423_v62 = vsel %vm418_vm0, %v1427_v26, %v407_v60 }
 0x135   :  { %v431_v3 = vmul.f32 %v427_v58, %v423_v62  ;;  %v1039_v62 = vld [vmem:[#allocation3 + $0xcc] sm:$0xf0] }
 0x13b   :  { %v362_v44 = vpop.permute.xlu0 %361  ;;  %v1465_v0 = vpop.permute.xlu1 %357 }
 0x13c   :  { %v1467_v1 = vpop.permute.xlu2 %410  ;;  %v378_v14 = vsel %vm373_vm1, %v1465_v0, %v362_v44 }
 0x13d   :  { %v421_v2 = vsel %vm418_vm0, %v407_v60, %v1467_v1  ;;  %v386_v58 = vmul.f32 %v382_v6, %v378_v14 }
 0x13e   :  { %v432_v12 = vmul.f32 %v428_v59, %v421_v2 }
 0x140   :  { %v439_v13 = vpack.c.bf16 %v432_v12, %v431_v3  ;;  %v959_v3 = vld [vmem:[#allocation3 + $0xd0] sm:$0xf0] }
 0x142   :  { %443 = vst [vmem:[#allocation3 + $0xe0] sm:$0xff] %v439_v13 }
 0x143   :  { %v317_v17 = vpop.permute.xlu0 %316  ;;  %v313_v18 = vpop.permute.xlu1 %312 }
 0x144   :  { %v1479_v20 = vpop.permute.xlu2 %365  ;;  %v333_v42 = vsel %vm328_vm2, %v313_v18, %v317_v17 }
 0x145   :  { %v376_v21 = vsel %vm373_vm1, %v362_v44, %v1479_v20  ;;  %v341_v31 = vmul.f32 %v337_v23, %v333_v42 }
 0x146   :  { %v387_v59 = vmul.f32 %v383_v7, %v376_v21 }
 0x148   :  { %v394_v22 = vpack.c.bf16 %v387_v59, %v386_v58 }
 0x149   :  { %v973_v27 = vld [vmem:[#allocation3 + $0xe0] sm:$0xf]  ;;  %v1041_v28 = vld [vmem:[#allocation3 + $0xe4] sm:$0xf] }
 0x14a   :  { %398 = vst [vmem:[#allocation3 + $0xc0] sm:$0xff] %v394_v22  ;;  %v974_v33 = vor.u32 %v1043_v48, %v973_v27  ;;  %v978_v54 = vor.u32 %v1041_v28, %v975_v25  ;;  %v1035_v48 = vld [vmem:[#allocation3 + $0xac] sm:$0xf0]  ;;  %v943_v25 = vld [vmem:[#allocation3 + $0xb0] sm:$0xf0] }
 0x14b   :  { %v1490_v43 = vpop.permute.xlu0 %263  ;;  %v260_v51 = vpop.permute.xlu1 %259 }
 0x14c   :  { %723 = vmatpush.bf16.msra.mxu0 %v974_v33  ;;  %751 = vmatpush.bf16.msra.mxu2 %v978_v54  ;;  %v321_v6 = vpop.permute.xlu2 %320  ;;  %v280_v14 = vsel %vm275_vm3, %v260_v51, %v1490_v43 }
 0x14d   :  { %v331_v7 = vsel %vm328_vm2, %v317_v17, %v321_v6  ;;  %v289_v58 = vmul.f32 %v285_v37, %v280_v14  ;;  %v1027_v14 = vld [vmem:[#allocation3 + $0x6c] sm:$0xf0] }
 0x14e   :  { %v342_v53 = vmul.f32 %v338_v24, %v331_v7 }
 0x150   :  { %v349_v60 = vpack.c.bf16 %v342_v53, %v341_v31  ;;  %v925_v31 = vld [vmem:[#allocation3 + $0x80] sm:$0xf]  ;;  %v1029_v53 = vld [vmem:[#allocation3 + $0x84] sm:$0xf] }
 0x151   :  { %v957_v44 = vld [vmem:[#allocation3 + $0xc0] sm:$0xf]  ;;  %v1037_v2 = vld [vmem:[#allocation3 + $0xc4] sm:$0xf] }
 0x152   :  { %353 = vst [vmem:[#allocation3 + $0xa0] sm:$0xff] %v349_v60  ;;  %v958_v12 = vor.u32 %v1039_v62, %v957_v44  ;;  %v962_v13 = vor.u32 %v1037_v2, %v959_v3  ;;  %v1031_v60 = vld [vmem:[#allocation3 + $0x8c] sm:$0xf0]  ;;  %v927_v62 = vld [vmem:[#allocation3 + $0x90] sm:$0xf0] }
 0x153   :  { %v1501_v21 = vpop.permute.xlu0 %214  ;;  %v1503_v17 = vpop.permute.xlu1 %173  ;;  %v926_v3 = vor.u32 %v1031_v60, %v925_v31 }
 0x154   :  { %724 = vmatpush.bf16.msra.mxu0 %v958_v12  ;;  %752 = vmatpush.bf16.msra.mxu2 %v962_v13  ;;  %v1505_v23 = vpop.permute.xlu2 %271  ;;  %v930_v12 = vor.u32 %v1029_v53, %v927_v62 }
 0x155   :  { %v282_v24 = vsel %vm275_vm3, %v1505_v23, %v260_v51 }
 0x156   :  { %v288_v59 = vmul.f32 %v284_v36, %v282_v24 }
 0x158   :  { %v296_v22 = vpack.c.bf16 %v289_v58, %v288_v59 }
 0x159   :  { %v941_v27 = vld [vmem:[#allocation3 + $0xa0] sm:$0xf]  ;;  %v1033_v28 = vld [vmem:[#allocation3 + $0xa4] sm:$0xf] }
 0x15a   :  { %300 = vst [vmem:[#allocation3 + $0x60] sm:$0xff] %v296_v22  ;;  %v942_v33 = vor.u32 %v1035_v48, %v941_v27  ;;  %v946_v54 = vor.u32 %v1033_v28, %v943_v25 }
 0x15b   :  { %v1514_v42 = vpop.permute.xlu0 %126  ;;  %v123_v7 = vpop.permute.xlu1 %122 }
 0x15c   :  { %725 = vmatpush.bf16.msra.mxu0 %v942_v33  ;;  %753 = vmatpush.bf16.msra.mxu2 %v946_v54  ;;  %v325_v51 = vpop.permute.xlu2 %324  ;;  %v145_v22 = vsel %vm140_vm6, %v123_v7, %v1514_v42 }
 0x15d   :  { %v329_v37 = vsel %vm328_vm2, %v321_v6, %v325_v51  ;;  %v335_v36 = vsel %vm328_vm2, %v325_v51, %v313_v18  ;;  %v911_v6 = vld [vmem:[#allocation3 + $0x70] sm:$0xf0] }
 0x15e   :  { %v343_v44 = vmul.f32 %v339_v52, %v329_v37  ;;  %v344_v2 = vmul.f32 %v340_v10, %v335_v36 }
 0x160   :  { %v350_v13 = vpack.c.bf16 %v344_v2, %v343_v44  ;;  %726 = vmatpush.bf16.msra.mxu0 %v926_v3  ;;  %754 = vmatpush.bf16.msra.mxu2 %v930_v12  ;;  %v287_v2 = vperm.slane %v1280_v5, 3 }
 0x161   :  { %v909_v24 = vld [vmem:[#allocation3 + $0x60] sm:$0xf]  ;;  %v1025_v58 = vld [vmem:[#allocation3 + $0x64] sm:$0xf] }
 0x162   :  { %354 = vst [vmem:[#allocation3 + $0xa8] sm:$0xff] %v350_v13  ;;  %v910_v59 = vor.u32 %v1027_v14, %v909_v24  ;;  %v914_v18 = vor.u32 %v1025_v58, %v911_v6 }
 0x163   :  { %v370_v52 = vpop.permute.xlu0 %369  ;;  %v1527_v48 = vpop.permute.xlu1 %447 }
 0x164   :  { %v374_v10 = vsel %vm373_vm1, %v1479_v20, %v370_v52  ;;  %v380_v27 = vsel %vm373_vm1, %v370_v52, %v1465_v0  ;;  %v1535_v28 = vpop.permute.xlu2 %134  ;;  %727 = vmatpush.bf16.msra.mxu0 %v910_v59  ;;  %755 = vmatpush.bf16.msra.mxu2 %v914_v18  ;;  %v154_v20 = vmul.f32 %v150_v35, %v145_v22 }
 0x165   :  { %v388_v25 = vmul.f32 %v384_v49, %v374_v10  ;;  %v389_v33 = vmul.f32 %v385_v63, %v380_v27  ;;  %v147_v54 = vsel %vm140_vm6, %v1535_v28, %v123_v7  ;;  %v190_v49 = vsel %vm185_vm5, %v1460_v61, %v1503_v17 }
 0x166   :  { %v153_v0 = vmul.f32 %v149_v34, %v147_v54  ;;  %v199_v36 = vmul.f32 %v195_v15, %v190_v49  ;;  %v235_v15 = vsel %vm230_vm4, %v1501_v21, %v1452_v45 }
 0x167   :  { %v395_v31 = vpack.c.bf16 %v389_v33, %v388_v25  ;;  %v244_v13 = vmul.f32 %v240_v47, %v235_v15 }
 0x168   :  { %v161_v53 = vpack.c.bf16 %v154_v20, %v153_v0 }
 0x169   :  { %399 = vst [vmem:[#allocation3 + $0xc8] sm:$0xff] %v395_v31  ;;  %v949_v55 = vld [vmem:[#allocation3 + $0xa8] sm:$0xf] }
 0x16a   :  { %165 = vst [vmem:[#allocation3] sm:$0xff] %v161_v53 }
 0x16b   :  { %v1552_v63 = vpop.permute.xlu0 %181  ;;  %v415_v51 = vpop.permute.xlu1 %414 }
 0x16c   :  { %v192_v35 = vsel %vm185_vm5, %v1552_v63, %v1460_v61  ;;  %v419_v34 = vsel %vm418_vm0, %v1467_v1, %v415_v51  ;;  %v425_v7 = vsel %vm418_vm0, %v415_v51, %v1427_v26  ;;  %v460_v37 = vpop.permute.xlu2 %459  ;;  %v1062_v26 = vld [vmem:[%s1743_s5 + $0x38] ss:$0 sm:$0xff] }
 0x16d   :  { %v198_v60 = vmul.f32 %v194_v16, %v192_v35  ;;  %v433_v62 = vmul.f32 %v429_v8, %v419_v34  ;;  %v434_v61 = vmul.f32 %v430_v9, %v425_v7  ;;  %v470_v8 = vsel %vm463_vm7, %v460_v37, %v1527_v48  ;;  %v1063_v9 = vld [vmem:[%s1743_s5 + $0x30] ss:$0 sm:$0xff] }
 0x16e   :  { %v286_v16 = vperm.slane %v1275_v4, 3  ;;  %v479_v14 = vmul.f32 %v1062_v26, %v470_v8 }
 0x16f   :  { %v206_v1 = vpack.c.bf16 %v199_v36, %v198_v60  ;;  %v440_v44 = vpack.c.bf16 %v434_v61, %v433_v62  ;;  %v1023_v36 = vld [vmem:[#allocation3 + $0x4c] sm:$0xf0]  ;;  %v1064_v60 = vld [vmem:[%s1743_s5 + $0x20] ss:$0 sm:$0xff]  ;;  %v1065_v62 = vld [vmem:[%s1743_s5 + $0x28] ss:$0 sm:$0xff] }
 0x170   :  { %v895_v61 = vld [vmem:[#allocation3 + $0x50] sm:$0xf0] }
 0x171   :  { %210 = vst [vmem:[#allocation3 + $0x20] sm:$0xff] %v206_v1 }
 0x172   :  { %444 = vst [vmem:[#allocation3 + $0xe8] sm:$0xff] %v440_v44 }
 0x173   :  { %v456_v3 = vpop.permute.xlu0 %455  ;;  %v227_v12 = vpop.permute.xlu1 %226 }
 0x174   :  { %v464_v24 = vsel %vm463_vm7, %v456_v3, %v460_v37  ;;  %v237_v58 = vsel %vm230_vm4, %v227_v12, %v1501_v21  ;;  %v270_v6 = vpop.permute.xlu2 %269 }
 0x175   :  { %v478_v59 = vmul.f32 %v1063_v9, %v464_v24  ;;  %v243_v18 = vmul.f32 %v239_v46, %v237_v58  ;;  %v277_v22 = vsel %vm275_vm3, %v270_v6, %v1345_v38  ;;  %v279_v57 = vsel %vm275_vm3, %v1347_v39, %v270_v6 }
 0x176   :  { %v294_v47 = vmul.f32 %v286_v16, %v279_v57  ;;  %v295_v52 = vmul.f32 %v287_v2, %v277_v22  ;;  %v242_v46 = vperm.slane %v1280_v5, 2 }
 0x177   :  { %v485_v10 = vpack.c.bf16 %v479_v14, %v478_v59  ;;  %v251_v27 = vpack.c.bf16 %v244_v13, %v243_v18 }
 0x178   :  { %v299_v25 = vpack.c.bf16 %v295_v52, %v294_v47  ;;  %v1017_v13 = vld [vmem:[#allocation3 + $0x24] sm:$0xf]  ;;  %v879_v52 = vld [vmem:[#allocation3 + $0x30] sm:$0xf0] }
 0x179   :  { %489 = vst [vmem:[#allocation3 + $0x108] sm:$0xff] %v485_v10 }
 0x17a   :  { %255 = vst [vmem:[#allocation3 + $0x40] sm:$0xff] %v251_v27  ;;  %v882_v27 = vor.u32 %v1017_v13, %v879_v52 }
 0x17b   :  { %303 = vst [vmem:[#allocation3 + $0x78] sm:$0xff] %v299_v25  ;;  %v462_v21 = vpop.permute.xlu0 %461  ;;  %v268_v33 = vpop.permute.xlu1 %267  ;;  %v861_v25 = vld [vmem:[#allocation3] sm:$0xf] }
 0x17c   :  { %v465_v38 = vsel %vm463_vm7, %v1458_v30, %v462_v21  ;;  %v471_v39 = vsel %vm463_vm7, %v462_v21, %v1396_v11  ;;  %v276_v54 = vsel %vm275_vm3, %v268_v33, %v1505_v23  ;;  %v278_v20 = vsel %vm275_vm3, %v1490_v43, %v268_v33  ;;  %v223_v0 = vpop.permute.xlu2 %222  ;;  %v1013_v21 = vld [vmem:[#allocation3 + $0x4] sm:$0xf]  ;;  %v1012_v33 = vld [vmem:[%s1746_s2 + $0x4] sm:$0xf0] }
 0x17d   :  { %v482_v31 = vmul.f32 %v1063_v9, %v465_v38  ;;  %v483_v53 = vmul.f32 %v1062_v26, %v471_v39  ;;  %v290_v49 = vmul.f32 %v286_v16, %v278_v20  ;;  %v291_v51 = vmul.f32 %v287_v2, %v276_v54  ;;  %v1042_v20 = vld [vmem:[#allocation3 + $0xec] sm:$0xf] }
 0x17e   :  { %v231_v35 = vsel %vm230_vm4, %v223_v0, %v227_v12  ;;  %v233_v34 = vsel %vm230_vm4, %v1452_v45, %v223_v0  ;;  %v196_v26 = vperm.slane %v1275_v4, 1  ;;  %v197_v2 = vperm.slane %v1280_v5, 1  ;;  %v877_v12 = vld [vmem:[#allocation3 + $0x20] sm:$0xf]  ;;  %v855_v0 = vld [vmem:[%s1746_s2 + $0x8] sm:$0xf0] }
 0x17f   :  { %v487_v7 = vpack.c.bf16 %v483_v53, %v482_v31  ;;  %v297_v37 = vpack.c.bf16 %v291_v51, %v290_v49  ;;  %v245_v23 = vmul.f32 %v241_v56, %v233_v34  ;;  %v246_v43 = vmul.f32 %v242_v46, %v231_v35  ;;  %v1015_v35 = vld [vmem:[#allocation3 + $0xc] sm:$0xf0] }
 0x180   :  { %v997_v31 = vld [vmem:[#allocation3 + $0x108] sm:$0xf] }
 0x181   :  { %491 = vst [vmem:[#allocation3 + $0x118] sm:$0xff] %v487_v7  ;;  %v252_v45 = vpack.c.bf16 %v246_v43, %v245_v23  ;;  %v893_v1 = vld [vmem:[#allocation3 + $0x40] sm:$0xf]  ;;  %v1021_v44 = vld [vmem:[#allocation3 + $0x44] sm:$0xf] }
 0x182   :  { %301 = vst [vmem:[#allocation3 + $0x68] sm:$0xff] %v297_v37  ;;  %v894_v15 = vor.u32 %v1023_v36, %v893_v1  ;;  %v898_v8 = vor.u32 %v1021_v44, %v895_v61  ;;  %v1046_v7 = vld [vmem:[#allocation3 + $0x10c] sm:$0xf]  ;;  %v862_v37 = vor.u32 %v1015_v35, %v861_v25  ;;  %v863_v23 = vld [vmem:[#allocation3 + $0x10] sm:$0xf0] }
 0x183   :  { %256 = vst [vmem:[#allocation3 + $0x48] sm:$0xff] %v252_v45  ;;  %v452_v9 = vpop.permute.xlu0 %451  ;;  %v454_v16 = vpop.permute.xlu1 %453  ;;  %v983_v43 = vld [vmem:[#allocation3 + $0xf8] sm:$0xf0]  ;;  %v866_v45 = vor.u32 %v1013_v21, %v863_v23  ;;  %v933_v35 = vld [vmem:[#allocation3 + $0x88] sm:$0xf] }
 0x184   :  { %v466_v14 = vsel %vm463_vm7, %v452_v9, %v456_v3  ;;  %v468_v24 = vsel %vm463_vm7, %v1527_v48, %v452_v9  ;;  %v467_v58 = vsel %vm463_vm7, %v454_v16, %v1458_v30  ;;  %v469_v6 = vsel %vm463_vm7, %v1396_v11, %v454_v16  ;;  %v180_v59 = vpop.permute.xlu2 %179  ;;  %728 = vmatpush.bf16.msra.mxu0 %v894_v15  ;;  %v1019_v3 = vld [vmem:[#allocation3 + $0x2c] sm:$0xf0]  ;;  %v853_v48 = vld [vmem:[%s1746_s2] sm:$0xf] }
 0x185   :  { %v476_v18 = vmul.f32 %v1064_v60, %v468_v24  ;;  %v477_v22 = vmul.f32 %v1065_v62, %v466_v14  ;;  %v480_v57 = vmul.f32 %v1064_v60, %v469_v6  ;;  %v481_v47 = vmul.f32 %v1065_v62, %v467_v58  ;;  %756 = vmatpush.bf16.msra.mxu2 %v898_v8  ;;  %v1038_v14 = vld [vmem:[#allocation3 + $0xcc] sm:$0xf] }
 0x186   :  { %v187_v30 = vsel %vm185_vm5, %v180_v59, %v1416_v19  ;;  %v189_v11 = vsel %vm185_vm5, %v1355_v41, %v180_v59  ;;  %v878_v10 = vor.u32 %v1019_v3, %v877_v12  ;;  %v1011_v41 = vld [vmem:[%s1746_s2 + $0x4] sm:$0xf]  ;;  %v1667_v60 = vor.u32 %v1012_v33, %v853_v48  ;;  %v1034_v6 = vld [vmem:[#allocation3 + $0xac] sm:$0xf] }
 0x187   :  { %v484_v38 = vpack.c.bf16 %v477_v22, %v476_v18  ;;  %v486_v39 = vpack.c.bf16 %v481_v47, %v480_v57  ;;  %v204_v54 = vmul.f32 %v196_v26, %v189_v11  ;;  %v205_v19 = vmul.f32 %v197_v2, %v187_v30  ;;  %v1044_v47 = vld [vmem:[#allocation3 + $0xf4] sm:$0xf0]  ;;  %v951_v3 = vld [vmem:[#allocation3 + $0xb8] sm:$0xf0] }
 0x188   :  { %729 = vmatpush.bf16.msra.mxu0 %v878_v10  ;;  %v1048_v53 = vld [vmem:[#allocation3 + $0x114] sm:$0xf0]  ;;  %v999_v49 = vld [vmem:[#allocation3 + $0x118] sm:$0xf0]  ;;  %v986_v1 = vor.u32 %v1042_v20, %v983_v43  ;;  %v1669_v44 = vor.u32 %v1011_v41, %v855_v0  ;;  %v151_v58 = vperm.slane %v1275_v4, 0  ;;  %v152_v59 = vperm.slane %v1280_v5, 0 }
 0x189   :  { %488 = vst [vmem:[#allocation3 + $0x100] sm:$0xff] %v484_v38  ;;  %v209_v51 = vpack.c.bf16 %v205_v19, %v204_v54  ;;  %757 = vmatpush.bf16.msra.mxu2 %v882_v27  ;;  %v998_v34 = vor.u32 %v1048_v53, %v997_v31  ;;  %v1002_v36 = vor.u32 %v1046_v7, %v999_v49  ;;  %v965_v54 = vld [vmem:[#allocation3 + $0xc8] sm:$0xf]  ;;  %v1040_v20 = vld [vmem:[#allocation3 + $0xd4] sm:$0xf0] }
 0x18a   :  { %490 = vst [vmem:[#allocation3 + $0x110] sm:$0xff] %v486_v39  ;;  %v954_v11 = vor.u32 %v1034_v6, %v951_v3  ;;  %v935_v41 = vld [vmem:[#allocation3 + $0x98] sm:$0xf0]  ;;  %v1036_v31 = vld [vmem:[#allocation3 + $0xb4] sm:$0xf0] }
 0x18b   :  { %213 = vst [vmem:[#allocation3 + $0x38] sm:$0xff] %v209_v51  ;;  %v225_v62 = vpop.permute.xlu0 %224  ;;  %v178_v61 = vpop.permute.xlu1 %177  ;;  %800 = vmatpush.bf16.msra.mxu3 %v998_v34  ;;  %v919_v53 = vld [vmem:[#allocation3 + $0x78] sm:$0xf0]  ;;  %v950_v49 = vor.u32 %v1036_v31, %v949_v55  ;;  %v1032_v7 = vld [vmem:[#allocation3 + $0x94] sm:$0xf0] }
 0x18c   :  { %v232_v15 = vsel %vm230_vm4, %v225_v62, %v1330_v29  ;;  %v234_v8 = vsel %vm230_vm4, %v1370_v50, %v225_v62  ;;  %v186_v9 = vsel %vm185_vm5, %v178_v61, %v1552_v63  ;;  %v188_v16 = vsel %vm185_vm5, %v1503_v17, %v178_v61  ;;  %730 = vmatpush.bf16.msra.mxu0 %v862_v37  ;;  %v967_v17 = vld [vmem:[#allocation3 + $0xd8] sm:$0xf0]  ;;  %v1022_v37 = vld [vmem:[#allocation3 + $0x4c] sm:$0xf]  ;;  %v1028_v61 = vld [vmem:[#allocation3 + $0x74] sm:$0xf0] }
 0x18d   :  { %v249_v12 = vmul.f32 %v241_v56, %v234_v8  ;;  %v250_v13 = vmul.f32 %v242_v46, %v232_v15  ;;  %v200_v29 = vmul.f32 %v196_v26, %v188_v16  ;;  %v201_v50 = vmul.f32 %v197_v2, %v186_v9  ;;  %758 = vmatpush.bf16.msra.mxu2 %v866_v45  ;;  %v981_v2 = vld [vmem:[#allocation3 + $0xe8] sm:$0xf] }
 0x18e   :  { %1005 = vmatmul.msk.bf16.vlgmr.msra.gmra.mxu3 %vm719_vm8, %v1669_v44  ;;  %v970_v56 = vor.u32 %v1038_v14, %v967_v17  ;;  %v982_v30 = vor.u32 %v1044_v47, %v981_v2  ;;  %v934_v23 = vor.u32 %v1032_v7, %v933_v35 }
 0x18f   :  { %807 = vmatpush.bf16.msrb.mxu3 %v986_v1  ;;  %v254_v63 = vpack.c.bf16 %v250_v13, %v249_v12  ;;  %v207_v24 = vpack.c.bf16 %v201_v50, %v200_v29  ;;  %731 = vmatmul.bf16.vlgmr.msra.gmra.mxu0 %v1667_v60  ;;  %v901_v12 = vld [vmem:[#allocation3 + $0x48] sm:$0xf] }
 0x190   :  { %828 = vmatpush.bf16.msrb.mxu0 %v1002_v36  ;;  %759 = vmatmul.bf16.vlgmr.msra.gmra.mxu2 %v1667_v60  ;;  %v989_v46 = vld [vmem:[#allocation3 + $0x100] sm:$0xf]  ;;  %v1045_v26 = vld [vmem:[#allocation3 + $0x104] sm:$0xf]  ;;  %v917_v36 = vld [vmem:[#allocation3 + $0x68] sm:$0xf] }
 0x191   :  { %258 = vst [vmem:[#allocation3 + $0x58] sm:$0xff] %v254_v63  ;;  %v1047_v18 = vld [vmem:[#allocation3 + $0x10c] sm:$0xf0]  ;;  %v991_v22 = vld [vmem:[#allocation3 + $0x110] sm:$0xf0]  ;;  %v918_v1 = vor.u32 %v1028_v61, %v917_v36 }
 0x192   :  { %211 = vst [vmem:[#allocation3 + $0x28] sm:$0xff] %v207_v24  ;;  %v990_v4 = vor.u32 %v1047_v18, %v989_v46  ;;  %v994_v57 = vor.u32 %v1045_v26, %v991_v22  ;;  %v887_v45 = vld [vmem:[#allocation3 + $0x38] sm:$0xf0] }
 0x193   :  { %808 = vmatpush.bf16.msrb.mxu3 %v970_v56  ;;  %v131_v52 = vpop.permute.xlu0 %130  ;;  %v133_v48 = vpop.permute.xlu1 %132 }
 0x194   :  { %v141_v10 = vsel %vm140_vm6, %v131_v52, %v1535_v28  ;;  %v143_v5 = vsel %vm140_vm6, %v1514_v42, %v131_v52  ;;  %744 = vmatpush.bf16.msra.mxu1 %v990_v4  ;;  %v142_v27 = vsel %vm140_vm6, %v133_v48, %v1442_v32  ;;  %v144_v25 = vsel %vm140_vm6, %v1444_v40, %v133_v48  ;;  %v1030_v28 = vld [vmem:[#allocation3 + $0x8c] sm:$0xf] }
 0x195   :  { %v155_v21 = vmul.f32 %v151_v58, %v143_v5  ;;  %v156_v33 = vmul.f32 %v152_v59, %v141_v10  ;;  %v159_v38 = vmul.f32 %v151_v58, %v144_v25  ;;  %v160_v39 = vmul.f32 %v152_v59, %v142_v27  ;;  %772 = vmatpush.bf16.msrb.mxu2 %v994_v57  ;;  %v1026_v40 = vld [vmem:[#allocation3 + $0x6c] sm:$0xf] }
 0x196   :  { %v966_v32 = vor.u32 %v1040_v20, %v965_v54  ;;  %v938_v0 = vor.u32 %v1030_v28, %v935_v41  ;;  %v922_v51 = vor.u32 %v1026_v40, %v919_v53 }
 0x197   :  { %809 = vmatpush.bf16.msrb.mxu3 %v954_v11  ;;  %v162_v19 = vpack.c.bf16 %v156_v33, %v155_v21  ;;  %v164_v42 = vpack.c.bf16 %v160_v39, %v159_v38  ;;  %1003 = vmatmul.msk.bf16.vlgmr.msra.gmra.mxu1 %vm719_vm8, %v1669_v44 }
 0x198   :  { %779 = vmatpush.bf16.msrb.mxu1 %v982_v30  ;;  %v903_v34 = vld [vmem:[#allocation3 + $0x58] sm:$0xf0]  ;;  %v1024_v8 = vld [vmem:[#allocation3 + $0x54] sm:$0xf0] }
 0x199   :  { %166 = vst [vmem:[#allocation3 + $0x8] sm:$0xff] %v162_v19  ;;  %v906_v43 = vor.u32 %v1022_v37, %v903_v34  ;;  %v1018_v62 = vld [vmem:[#allocation3 + $0x2c] sm:$0xf]  ;;  %v902_v13 = vor.u32 %v1024_v8, %v901_v12  ;;  %v885_v50 = vld [vmem:[#allocation3 + $0x28] sm:$0xf] }
 0x19a   :  { %168 = vst [vmem:[#allocation3 + $0x18] sm:$0xff] %v164_v42  ;;  %v890_v15 = vor.u32 %v1018_v62, %v887_v45 }
 0x19b   :  { %810 = vmatpush.bf16.msrb.mxu3 %v938_v0 }
 0x19c   :  { %780 = vmatpush.bf16.msrb.mxu1 %v966_v32 }
 0x19f   :  { %811 = vmatpush.bf16.msrb.mxu3 %v922_v51  ;;  %1006 = vmatmul.msk.bf16.vlgmr.msrb.gmra.mxu0 %vm719_vm8, %v1669_v44 }
 0x1a0   :  { %781 = vmatpush.bf16.msrb.mxu1 %v950_v49  ;;  %1004 = vmatmul.msk.bf16.vlgmr.msrb.gmra.mxu2 %vm719_vm8, %v1669_v44  ;;  %v1014_v9 = vld [vmem:[#allocation3 + $0xc] sm:$0xf]  ;;  %v1020_v44 = vld [vmem:[#allocation3 + $0x34] sm:$0xf0]  ;;  %v869_v63 = vld [vmem:[#allocation3 + $0x8] sm:$0xf] }
 0x1a1   :  { %v871_v16 = vld [vmem:[#allocation3 + $0x18] sm:$0xf0]  ;;  %v886_v14 = vor.u32 %v1020_v44, %v885_v50  ;;  %v1016_v24 = vld [vmem:[#allocation3 + $0x14] sm:$0xf0] }
 0x1a2   :  { %v874_v29 = vor.u32 %v1014_v9, %v871_v16  ;;  %v870_v17 = vor.u32 %v1016_v24, %v869_v63 }
 0x1a3   :  { %812 = vmatpush.bf16.msrb.mxu3 %v906_v43 }
 0x1a4   :  { %782 = vmatpush.bf16.msrb.mxu1 %v934_v23 }
 0x1a7   :  { %813 = vmatpush.bf16.msrb.mxu3 %v890_v15 }
 0x1a8   :  { %783 = vmatpush.bf16.msrb.mxu1 %v918_v1 }
 0x1ab   :  { %814 = vmatpush.bf16.msrb.mxu3 %v874_v29 }
 0x1ac   :  { %784 = vmatpush.bf16.msrb.mxu1 %v902_v13 }
 0x1ae   :  { %815 = vmatmul.bf16.vlgmr.msrb.gmra.mxu3 %v1667_v60 }
 0x1b0   :  { %785 = vmatpush.bf16.msrb.mxu1 %v886_v14 }
 0x1b4   :  { %786 = vmatpush.bf16.msrb.mxu1 %v870_v17 }
 0x1b7   :  { %787 = vmatmul.bf16.vlgmr.msrb.gmra.mxu1 %v1667_v60 }
 0x20c   :  { %v732_v58 = vpop.f32.mrf.mxu0 }
 0x211   :  { %v802_v22 = vpop.f32.mrf.mxu3 }
 0x213   :  { %v760_v6 = vpop.f32.mrf.mxu2 }
 0x214   :  { %v746_v56 = vpop.f32.mrf.mxu1  ;;  %v734_v26 = vpop.f32.mrf.mxu0 }
 0x215   :  { %v747_v46 = vadd.f32 %v746_v56, %v732_v58 }
 0x217   :  { %835 = vst [vmem:[%s1747_s6] sm:$0xff] %v747_v46 }
 0x219   :  { %v804_v60 = vpop.f32.mrf.mxu3 }
 0x21b   :  { %v762_v2 = vpop.f32.mrf.mxu2 }
 0x21c   :  { %v748_v59 = vpop.f32.mrf.mxu1  ;;  %v830_v52 = vpop.f32.mrf.mxu0 }
 0x21d   :  { %v749_v18 = vadd.f32 %v748_v59, %v734_v26 }
 0x21f   :  { %837 = vst [vmem:[%s1747_s6 + $0x10] sm:$0xff] %v749_v18 }
 0x223   :  { %v774_v4 = vpop.f32.mrf.mxu2 }
 0x224   :  { %v775_v57 = vadd.f32 %v774_v4, %v760_v6  ;;  %v832_v5 = vpop.f32.mrf.mxu0 }
 0x226   :  { %836 = vst [vmem:[%s1747_s6 + $0x8] sm:$0xff] %v775_v57 }
 0x22b   :  { %v776_v47 = vpop.f32.mrf.mxu2 }
 0x22c   :  { %v777_v3 = vadd.f32 %v776_v47, %v762_v2 }
 0x22e   :  { %838 = vst [vmem:[%s1747_s6 + $0x18] sm:$0xff] %v777_v3 }
 0x231   :  { %v816_v48 = vpop.f32.mrf.mxu3 }
 0x232   :  { %v831_v30 = vadd.f32 %v830_v52, %v816_v48 }
 0x234   :  { %v788_v11 = vpop.f32.mrf.mxu1  ;;  %1008 = vst [vmem:[%s1747_s6 + $0x28] sm:$0xff] %v831_v30 }
 0x235   :  { %v803_v10 = vadd.f32 %v802_v22, %v788_v11 }
 0x237   :  { %1007 = vst [vmem:[%s1747_s6 + $0x20] sm:$0xff] %v803_v10 }
 0x239   :  { %v818_v27 = vpop.f32.mrf.mxu3 }
 0x23a   :  { %v833_v25 = vadd.f32 %v832_v5, %v818_v27 }
 0x23c   :  { %v790_v21 = vpop.f32.mrf.mxu1  ;;  %1010 = vst [vmem:[%s1747_s6 + $0x38] sm:$0xff] %v833_v25 }
 0x23d   :  { %v805_v33 = vadd.f32 %v804_v60, %v790_v21 }
 0x23f   :  { %1009 = vst [vmem:[%s1747_s6 + $0x30] sm:$0xff] %v805_v33 }

</bundles_post_ra>
